<compile_context>
chip_gen: v5e
topology: v5e:2x2
jax: 0.10.0
libtpu: 0.0.40
codegen_flags: <defaults>
</compile_context>

<pallas_src>
import functools

import jax
import jax.numpy as jnp
from jax.experimental import pallas as pl
from jax.experimental.pallas import tpu as pltpu


_LANE = 128
_TARGET_BLOCK_BYTES = 4 * 1024 * 1024  # ~4 MiB per block


def _hardtanh_kernel(x_ref, o_ref, *, min_val, max_val):
    o_ref[...] = jnp.clip(x_ref[...], min_val, max_val)


def _pick_2d_layout(n_pad, itemsize):
    """Choose a lane-dense (rows, cols) view and a row-tile for ~4 MiB blocks."""
    # Largest candidate multiple of 128 that divides the flat length.
    cols = _LANE
    for c in (16384, 8192, 4096, 2048, 1024, 512, 256):
        if n_pad % c == 0:
            cols = c
            break
    rows = n_pad // cols

    row_bytes = cols * itemsize
    cand = max(1, _TARGET_BLOCK_BYTES // row_bytes)
    if cand >= rows or rows <= 8:
        # Whole slab fits in one block (block dim == full array dim is legal
        # even when not a multiple of 8).
        tile_rows = rows
    else:
        # Multiple of 8 (sublane) rows per block, capped near the 4 MiB target.
        tile_rows = max(8, (min(cand, rows) // 8) * 8)
    return rows, cols, tile_rows


def hardtanh(x, min_val=-1.0, max_val=1.0):
    """Elementwise clamp(x, min_val, max_val) via a Pallas TPU kernel."""
    orig_shape = x.shape
    orig_dtype = x.dtype
    n = x.size

    x_flat = x.reshape(-1)

    # Minimal padding: only to a multiple of the 128-lane width, and only if
    # actually needed (typical NCHW activation sizes are already divisible).
    pad = (-n) % _LANE
    if pad:
        x_flat = jnp.pad(x_flat, (0, pad))
    n_pad = n + pad

    rows, cols, tile_rows = _pick_2d_layout(n_pad, x_flat.dtype.itemsize)
    x2d = x_flat.reshape(rows, cols)

    grid = (pl.cdiv(rows, tile_rows),)

    kernel = functools.partial(_hardtanh_kernel, min_val=min_val, max_val=max_val)

    out2d = pl.pallas_call(
        kernel,
        out_shape=jax.ShapeDtypeStruct((rows, cols), orig_dtype),
        grid=grid,
        in_specs=[pl.BlockSpec((tile_rows, cols), lambda i: (i, 0))],
        out_specs=pl.BlockSpec((tile_rows, cols), lambda i: (i, 0)),
        compiler_params=pltpu.CompilerParams(
            dimension_semantics=("parallel",),
            vmem_limit_bytes=48 * 1024 * 1024,
        ),
    )(x2d)

    if pad:
        out = out2d.reshape(-1)[:n].reshape(orig_shape)
    else:
        out = out2d.reshape(orig_shape)
    return out


class CustomHardTanh:
    """JAX/Pallas equivalent of the PyTorch CustomHardTanh module."""

    def __init__(self, min_val=-1.0, max_val=1.0):
        self.min_val = float(min_val)
        self.max_val = float(max_val)
        # min/max baked in as compile-time constants (one compile per pair).
        self._fn = jax.jit(
            functools.partial(hardtanh, min_val=self.min_val, max_val=self.max_val)
        )

    def __call__(self, x):
        return self._fn(x)


if __name__ == "__main__":
    key = jax.random.PRNGKey(0)
    # NCHW input, small shape: batch=2, channels=4, spatial=16x16
    x = jax.random.normal(key, (2, 4, 16, 16), dtype=jnp.float32) * 2.0

    mod = CustomHardTanh(min_val=-1.0, max_val=1.0)
    out = jax.block_until_ready(mod(x))

    # Correctness check against plain-JAX reference.
    ref = jnp.clip(x, -1.0, 1.0)
    assert out.shape == x.shape and out.dtype == x.dtype
    assert jnp.allclose(out, ref), "mismatch vs reference clamp"

    print("KERNEL_OK")
</pallas_src>

<mosaic_0001>
module attributes {stable_mosaic.version = 11 : i64} {
  func.func @_hardtanh_kernel(%arg0: i32, %arg1: memref<1x2048xf32, #tpu.memory_space<vmem>>, %arg2: memref<1x2048xf32, #tpu.memory_space<vmem>>) attributes {dimension_semantics = [#tpu.dimension_semantics<parallel>], iteration_bounds = array<i64: 1>, scalar_prefetch = 0 : i64, scratch_operands = 0 : i64, tpu.core_type = #tpu.core_type<tc>, window_params = [{transform_indices = @transform_0, window_bounds = array<i64: 1, 2048>}, {transform_indices = @transform_1, window_bounds = array<i64: 1, 2048>}]} {
    %c0 = arith.constant 0 : index
    %c0_0 = arith.constant 0 : index
    %0 = vector.load %arg1[%c0, %c0_0] : memref<1x2048xf32, #tpu.memory_space<vmem>>, vector<1x2048xf32>
    %cst = arith.constant -1.000000e+00 : f32
    %cst_1 = arith.constant 1.000000e+00 : f32
    %1 = vector.broadcast %cst : f32 to vector<1x2048xf32>
    %2 = arith.maximumf %1, %0 : vector<1x2048xf32>
    %3 = vector.broadcast %cst_1 : f32 to vector<1x2048xf32>
    %4 = arith.minimumf %3, %2 : vector<1x2048xf32>
    %c0_2 = arith.constant 0 : index
    %c0_3 = arith.constant 0 : index
    %5 = vector.load %arg2[%c0_2, %c0_3] : memref<1x2048xf32, #tpu.memory_space<vmem>>, vector<1x2048xf32>
    tpu.vector_store %arg2[%c0_2, %c0_3], %4 {strides = array<i32>} : memref<1x2048xf32, #tpu.memory_space<vmem>>, vector<1x2048xf32>,
    return
  }
  func.func @transform_0(%arg0: i32) -> (i32, i32) {
    %c0_i32 = arith.constant 0 : i32
    %c0_i32_0 = arith.constant 0 : i32
    return %arg0, %c0_i32 : i32, i32
  }
  func.func @transform_1(%arg0: i32) -> (i32, i32) {
    %c0_i32 = arith.constant 0 : i32
    %c0_i32_0 = arith.constant 0 : i32
    return %arg0, %c0_i32 : i32, i32
  }
}

</mosaic_0001>

<bundles_post_ra>
// kernel: hardtanh.1
= control target key start
LH: loop header
LB: loop body
LE: loop exit
PB: predicated region body
PF: predicated region fallthrough
CT: control target
= control target key end

     0   :  { %s44_s0 = inlined_call_operand.vmem [shape: f32[1,2048], index: 0, kind: input, shape index: {}]   ;;  %s45_s1 = inlined_call_operand.vmem [shape: f32[1,2048], index: 1, kind: output, shape index: {}]  }
   0x1   :  { %v8_v0 = vld [vmem:[%s44_s0] sm:$0xff]  ;;  %v9_v1 = vld [vmem:[%s44_s0 + $0x8] sm:$0xff] }
   0x2   :  { %v20_v2 = vclamps-f32 %v8_v0, 1.0  ;;  %v21_v3 = vclamps-f32 %v9_v1, 1.0 }
   0x4   :  { %14 = vst [vmem:[%s45_s1] sm:$0xff] %v20_v2 }
   0x5   :  { %15 = vst [vmem:[%s45_s1 + $0x8] sm:$0xff] %v21_v3 }

</bundles_post_ra>
